<compile_context>
chip_gen: v7x
topology: tpu7x:2x2x1
jax: 0.10.0
libtpu: 0.0.40
codegen_flags: <defaults>
</compile_context>

<pallas_src>
import jax
import jax.numpy as jnp
from jax import lax
from jax.experimental import pallas as pl
from jax.experimental.pallas import tpu as pltpu

_LANE_WIDTH = 1024      # lanes per row of the flat interleaved view (multiple of 256)
_TARGET_ROWS = 384      # rows per grid step: ~1.5 MiB/array block, ~4.5 MiB moved/step
_MIN_SPLIT_ROWS = 128   # force >=2 grid steps once there is this much data


def _cdiv(a, b):
    return -(-a // b)


def _round_up(n, m):
    return _cdiv(n, m) * m


def flow_sample_kernel(params_ref, x_ref, noise_ref, out_ref):
    """VPU/EUP-only body over the flat, channel-interleaved view.

    Flat index k of every (rows, C) block maps to (batch = k // 2,
    channel = k % 2); C is even, so channel == lane parity.

    params_ref: SMEM (8,)      [wm0, wm1, ws0, ws1, bm0, bm1, bs0, bs1]
    x_ref:      VMEM (rows, C) context value repeated once per channel
    noise_ref:  VMEM (rows, C) standard-normal noise (natural [B, 2] order)
    out_ref:    VMEM (rows, C) samples (natural [B, 2] order)
    """
    x = x_ref[...]
    noise = noise_ref[...]

    # Per-lane parameter vectors: lane parity selects channel 0 / channel 1.
    lanes = lax.broadcasted_iota(jnp.int32, (1, x.shape[-1]), 1)
    is_c0 = (lanes & 1) == 0
    w_mean = jnp.where(is_c0, params_ref[0], params_ref[1])
    w_lstd = jnp.where(is_c0, params_ref[2], params_ref[3])
    b_mean = jnp.where(is_c0, params_ref[4], params_ref[5])
    b_lstd = jnp.where(is_c0, params_ref[6], params_ref[7])

    # samples = means + exp(log_stds) * noise; full-slab unmasked store.
    out_ref[...] = (x * w_mean + b_mean) + jnp.exp(x * w_lstd + b_lstd) * noise


def _rows_per_step(rows_needed):
    """Balanced, 8-aligned rows per grid step; >=2 steps when data is big enough."""
    n_steps = _cdiv(rows_needed, _TARGET_ROWS)
    if n_steps == 1 and rows_needed >= 2 * _MIN_SPLIT_ROWS:
        n_steps = 2                 # let the DMA pipeline / v7x megacore do something
    if n_steps == 1:
        return rows_needed          # single full-extent block (legal for any row count)
    return _round_up(_cdiv(rows_needed, n_steps), 8)


def flow_sample(x, weight, bias, noise):
    """samples = Linear(1->4)(x)[:, :2] + exp(Linear(1->4)(x)[:, 2:]) * noise.

    x:      [B, 1] context.
    weight: [1, 4] = (in_features, out_features). A raw torch nn.Linear weight
            is [out, in] = (4, 1) and is transposed here defensively.
    bias:   [4].
    noise:  [B, 2] standard normal (explicit input so the result is verifiable
            against a pure-JAX reference; torch's RNG stream is not reproduced).
    Returns [B, num_samples=1, 2].
    """
    B = x.shape[0]
    C = _LANE_WIDTH

    weight = jnp.asarray(weight, jnp.float32)
    if weight.shape == (4, 1):          # torch nn.Linear layout -> (in, out)
        weight = weight.T
    assert weight.shape == (1, 4), f"expected Linear(1,4) weight, got {weight.shape}"
    bias = jnp.asarray(bias, jnp.float32).reshape(4)
    params = jnp.concatenate([weight.reshape(-1), bias])          # (8,) SMEM scalars

    # Flat, channel-interleaved (natural [B,2] row-major) view. All reshapes are
    # free; only the x channel-broadcast materializes a new array (plus a zero
    # pad when 2B does not divide the block size).
    n = 2 * B
    rows_needed = _cdiv(n, C)
    tb_r = _rows_per_step(rows_needed)
    grid_steps = _cdiv(rows_needed, tb_r)
    R = grid_steps * tb_r
    total = R * C

    x_rep = jnp.broadcast_to(x.astype(jnp.float32).reshape(B, 1), (B, 2)).reshape(-1)
    nz = noise.astype(jnp.float32).reshape(-1)
    if total != n:
        x_rep = jnp.pad(x_rep, (0, total - n))
        nz = jnp.pad(nz, (0, total - n))
    x2 = x_rep.reshape(R, C)
    nz2 = nz.reshape(R, C)

    out2 = pl.pallas_call(
        flow_sample_kernel,
        out_shape=jax.ShapeDtypeStruct((R, C), jnp.float32),
        grid=(grid_steps,),
        in_specs=[
            pl.BlockSpec(memory_space=pltpu.SMEM),             # params (8,) scalars
            pl.BlockSpec((tb_r, C), lambda i: (i, 0)),         # x (per-channel repeated)
            pl.BlockSpec((tb_r, C), lambda i: (i, 0)),         # noise
        ],
        out_specs=pl.BlockSpec((tb_r, C), lambda i: (i, 0)),
        compiler_params=pltpu.CompilerParams(
            dimension_semantics=("parallel",),                 # v7x: shard steps over 2 TCs
            vmem_limit_bytes=32 * 1024 * 1024,                 # explicit budget (v7x-safe)
        ),
    )(params, x2, nz2)

    samples = out2.reshape(-1)
    if total != n:
        samples = samples[:n]
    # [context_size, num_samples=1, 2], natural order — no transpose needed.
    return samples.reshape(B, 1, 2)


if __name__ == "__main__":
    key = jax.random.PRNGKey(0)
    k_x, k_w, k_b, k_n, k_x2, k_n2 = jax.random.split(key, 6)

    # Deterministic synthetic parameters for nn.Linear(1, 4), stored as
    # [in_features, out_features] so the math is x @ W + b.
    weight = jax.random.normal(k_w, (1, 4), dtype=jnp.float32) * 0.5
    bias = jax.random.normal(k_b, (4,), dtype=jnp.float32) * 0.1

    def reference(xc, nzc):
        p = xc @ weight + bias
        return (p[:, :2] + jnp.exp(p[:, 2:]) * nzc).reshape(xc.shape[0], 1, 2)

    # Small case consistent with the module (context batch = 8, num_samples = 1).
    B = 8
    x = jax.random.normal(k_x, (B, 1), dtype=jnp.float32)
    noise = jax.random.normal(k_n, (B, 2), dtype=jnp.float32)
    out = jax.block_until_ready(flow_sample(x, weight, bias, noise))
    assert out.shape == (B, 1, 2)
    assert jnp.allclose(out, reference(x, noise), atol=1e-5, rtol=1e-5)

    # Odd-sized case exercising the padded / multi-row path.
    B2 = 777
    x2 = jax.random.normal(k_x2, (B2, 1), dtype=jnp.float32)
    noise2 = jax.random.normal(k_n2, (B2, 2), dtype=jnp.float32)
    out2 = jax.block_until_ready(flow_sample(x2, weight, bias, noise2))
    assert out2.shape == (B2, 1, 2)
    assert jnp.allclose(out2, reference(x2, noise2), atol=1e-5, rtol=1e-5)

    print("KERNEL_OK")
</pallas_src>

<mosaic_0001>
module attributes {stable_mosaic.version = 11 : i64} {
  func.func @flow_sample_kernel(%arg0: i32, %arg1: memref<8xf32, #tpu.memory_space<smem>>, %arg2: memref<1x1024xf32, #tpu.memory_space<vmem>>, %arg3: memref<1x1024xf32, #tpu.memory_space<vmem>>, %arg4: memref<1x1024xf32, #tpu.memory_space<vmem>>) attributes {dimension_semantics = [#tpu.dimension_semantics<parallel>], iteration_bounds = array<i64: 1>, scalar_prefetch = 0 : i64, scratch_operands = 0 : i64, tpu.core_type = #tpu.core_type<tc>, window_params = [{transform_indices = @transform_0, window_bounds = array<i64: 8>}, {transform_indices = @transform_1, window_bounds = array<i64: 1, 1024>}, {transform_indices = @transform_2, window_bounds = array<i64: 1, 1024>}, {transform_indices = @transform_3, window_bounds = array<i64: 1, 1024>}]} {
    %c0 = arith.constant 0 : index
    %c0_0 = arith.constant 0 : index
    %0 = vector.load %arg2[%c0, %c0_0] : memref<1x1024xf32, #tpu.memory_space<vmem>>, vector<1x1024xf32>
    %c0_1 = arith.constant 0 : index
    %c0_2 = arith.constant 0 : index
    %1 = vector.load %arg3[%c0_1, %c0_2] : memref<1x1024xf32, #tpu.memory_space<vmem>>, vector<1x1024xf32>
    %2 = tpu.iota {dimensions = array<i32: 1>} : vector<1x1024xi32>
    %c1_i32 = arith.constant 1 : i32
    %3 = vector.broadcast %c1_i32 : i32 to vector<1x1024xi32>
    %4 = arith.andi %2, %3 : vector<1x1024xi32>
    %c0_i32 = arith.constant 0 : i32
    %5 = vector.broadcast %c0_i32 : i32 to vector<1x1024xi32>
    %6 = arith.cmpi eq, %4, %5 : vector<1x1024xi32>
    %c0_3 = arith.constant 0 : index
    %7 = memref.load %arg1[%c0_3] : memref<8xf32, #tpu.memory_space<smem>>
    %c1 = arith.constant 1 : index
    %8 = memref.load %arg1[%c1] : memref<8xf32, #tpu.memory_space<smem>>
    %9 = vector.broadcast %7 : f32 to vector<1x1024xf32>
    %10 = vector.broadcast %8 : f32 to vector<1x1024xf32>
    %11 = arith.select %6, %9, %10 : vector<1x1024xi1>, vector<1x1024xf32>
    %c2 = arith.constant 2 : index
    %12 = memref.load %arg1[%c2] : memref<8xf32, #tpu.memory_space<smem>>
    %c3 = arith.constant 3 : index
    %13 = memref.load %arg1[%c3] : memref<8xf32, #tpu.memory_space<smem>>
    %14 = vector.broadcast %12 : f32 to vector<1x1024xf32>
    %15 = vector.broadcast %13 : f32 to vector<1x1024xf32>
    %16 = arith.select %6, %14, %15 : vector<1x1024xi1>, vector<1x1024xf32>
    %c4 = arith.constant 4 : index
    %17 = memref.load %arg1[%c4] : memref<8xf32, #tpu.memory_space<smem>>
    %c5 = arith.constant 5 : index
    %18 = memref.load %arg1[%c5] : memref<8xf32, #tpu.memory_space<smem>>
    %19 = vector.broadcast %17 : f32 to vector<1x1024xf32>
    %20 = vector.broadcast %18 : f32 to vector<1x1024xf32>
    %21 = arith.select %6, %19, %20 : vector<1x1024xi1>, vector<1x1024xf32>
    %c6 = arith.constant 6 : index
    %22 = memref.load %arg1[%c6] : memref<8xf32, #tpu.memory_space<smem>>
    %c7 = arith.constant 7 : index
    %23 = memref.load %arg1[%c7] : memref<8xf32, #tpu.memory_space<smem>>
    %24 = vector.broadcast %22 : f32 to vector<1x1024xf32>
    %25 = vector.broadcast %23 : f32 to vector<1x1024xf32>
    %26 = arith.select %6, %24, %25 : vector<1x1024xi1>, vector<1x1024xf32>
    %27 = arith.mulf %0, %11 : vector<1x1024xf32>
    %28 = arith.addf %27, %21 : vector<1x1024xf32>
    %29 = arith.mulf %0, %16 : vector<1x1024xf32>
    %30 = arith.addf %29, %26 : vector<1x1024xf32>
    %31 = math.exp %30 : vector<1x1024xf32>
    %32 = arith.mulf %31, %1 : vector<1x1024xf32>
    %33 = arith.addf %28, %32 : vector<1x1024xf32>
    %c0_4 = arith.constant 0 : index
    %c0_5 = arith.constant 0 : index
    %34 = vector.load %arg4[%c0_4, %c0_5] : memref<1x1024xf32, #tpu.memory_space<vmem>>, vector<1x1024xf32>
    tpu.vector_store %arg4[%c0_4, %c0_5], %33 {strides = array<i32>} : memref<1x1024xf32, #tpu.memory_space<vmem>>, vector<1x1024xf32>,
    return
  }
  func.func @transform_0(%arg0: i32) -> i32 {
    %c0_i32 = arith.constant 0 : i32
    %c0_i32_0 = arith.constant 0 : i32
    return %c0_i32 : i32
  }
  func.func @transform_1(%arg0: i32) -> (i32, i32) {
    %c0_i32 = arith.constant 0 : i32
    %c0_i32_0 = arith.constant 0 : i32
    return %arg0, %c0_i32 : i32, i32
  }
  func.func @transform_2(%arg0: i32) -> (i32, i32) {
    %c0_i32 = arith.constant 0 : i32
    %c0_i32_0 = arith.constant 0 : i32
    return %arg0, %c0_i32 : i32, i32
  }
  func.func @transform_3(%arg0: i32) -> (i32, i32) {
    %c0_i32 = arith.constant 0 : i32
    %c0_i32_0 = arith.constant 0 : i32
    return %arg0, %c0_i32 : i32, i32
  }
}

</mosaic_0001>

<bundles_post_ra>
// kernel: tpu_custom_call.1
= control target key start
LH: loop header
LB: loop body
LE: loop exit
PB: predicated region body
PF: predicated region fallthrough
CT: control target
= control target key end

     0   :  { %8 = vsyncpa [#allocation5], 0  ;;  %s715_s0 = inlined_call_operand.hbm [shape: f32[8], index: 0, kind: input, shape index: {}]   ;;  %s716_s1 = inlined_call_operand.hbm [shape: f32[1,1024], index: 1, kind: input, shape index: {}]   ;;  %s717_s2 = inlined_call_operand.hbm [shape: f32[1,1024], index: 2, kind: input, shape index: {}]   ;;  %s718_s3 = inlined_call_operand.hbm [shape: f32[1,1024], index: 3, kind: output, shape index: {}]  }
   0x1   :  { %9 = vsyncpa [#allocation3], 0 }
   0x2   :  { %10 = vsyncpa [#allocation8], 0 }
   0x3   :  { %11 = vsyncpa [#allocation4], 0  ;;  %s397_s14 = scalar_lea.hbm %s715_s0, 16 }
   0x4   :  { %p398_p0 = scmp.ne.s32.totalorder %s715_s0, %s397_s14  ;;  %p401_p1 = scmp.lt.u32.totalorder %s397_s14, %s715_s0 }
   0x6   :  { %p403_p2 = pnand %p401_p1, %p398_p0 }
   0x8   :  { %406 = shalt.err (!%p403_p2)
}
   0x9   :  { %s481_s19 = smov [#allocation2]   ;;  %s482_s22 = smov [#allocation6]  }
   0xa   :  { %19 = dma.hbm_to_smem %s715_s0, 16, %s481_s19, [#allocation5]  }
   0xb   :  { %s26_s23 = sshll.u32 %s482_s22, 4  ;;  %s483_s24 = smov [#allocation7]   ;;  %s27_s23 = int_to_ptr.vmem [resolvable:$true] %s26_s23 }
   0xc   :  { %s36_s25 = sshll.u32 %s483_s24, 4  ;;  %s407_s28 = scalar_lea.hbm %s716_s1, 128  ;;  %s37_s25 = int_to_ptr.vmem [resolvable:$true] %s36_s25 }
   0xd   :  { %p408_p3 = scmp.ne.s32.totalorder %s716_s1, %s407_s28  ;;  %p411_p4 = scmp.lt.u32.totalorder %s407_s28, %s716_s1 }
   0xf   :  { %p413_p5 = pnand %p411_p4, %p408_p3 }
  0x11   :  { %416 = shalt.err (!%p413_p5)
}
  0x12   :  { %s417_s0 = scalar_lea.vmem %s27_s23, 128  ;;  %p422_p7 = scmp.lt.s32.totalorder %s27_s23, %s27_s23 }
  0x13   :  { %p418_p6 = scmp.ne.s32.totalorder %s27_s23, %s417_s0  ;;  %p423_p8 = scmp.lt.s32.totalorder %s417_s0, %s417_s0 }
  0x15   :  { %p424_p9 = por %p423_p8, %p422_p7 }
  0x17   :  { %p425_p10 = pnand %p424_p9, %p418_p6 }
  0x19   :  { %428 = shalt.err (!%p425_p10)
}
  0x1a   :  { %29 = dma.hbm_to_vmem [thread:$0]  %s716_s1, 128, %s27_s23, [#allocation3]  }
  0x1b   :  { %s429_s10 = scalar_lea.hbm %s717_s2, 128 }
  0x1c   :  { %p430_p11 = scmp.ne.s32.totalorder %s717_s2, %s429_s10  ;;  %p433_p12 = scmp.lt.u32.totalorder %s429_s10, %s717_s2 }
  0x1e   :  { %p435_p13 = pnand %p433_p12, %p430_p11 }
  0x20   :  { %438 = shalt.err (!%p435_p13)
}
  0x21   :  { %s439_s15 = scalar_lea.vmem %s37_s25, 128  ;;  %p444_p1 = scmp.lt.s32.totalorder %s37_s25, %s37_s25 }
  0x22   :  { %p440_p0 = scmp.ne.s32.totalorder %s37_s25, %s439_s15  ;;  %p445_p2 = scmp.lt.s32.totalorder %s439_s15, %s439_s15 }
  0x24   :  { %p446_p3 = por %p445_p2, %p444_p1 }
  0x26   :  { %p447_p4 = pnand %p446_p3, %p440_p0 }
  0x28   :  { %450 = shalt.err (!%p447_p4)
}
  0x29   :  { %39 = dma.hbm_to_vmem [thread:$0]  %s717_s2, 128, %s37_s25, [#allocation8]  }
  0x2a   :  { %473 = dma.done.wait [#allocation5], 16  }
  0x2b   :  { %474 = vsyncadd [#allocation5], 4294967280 }
  0x2c   :  { %475 = dma.done.wait [#allocation3], 128  }
  0x2d   :  { %476 = vsyncadd [#allocation3], 4294967168 }
  0x2e   :  { %477 = dma.done.wait [#allocation8], 128  }
  0x2f   :  { %478 = vsyncadd [#allocation8], 4294967168 }
  0x30   :  { %49 = sfence }
  0x31   :  { %v52_v0 = vlaneseq  ;;  %s77_s17 = sld [smem:[#allocation2]]  ;;  %s383_s18 = sld [smem:[#allocation2 + $0x1]]  ;;  %v484_v17 = vmov 1966171168  }
  0x32   :  { %s384_s19 = sld [smem:[#allocation2 + $0x2]]  ;;  %s385_s20 = sld [smem:[#allocation2 + $0x3]]  ;;  %v138_v18 = vunpack.c.l.s4 %v484_v17 }
  0x33   :  { %v53_v1 = vand.u32 127, %v52_v0  ;;  %s386_s2 = sld [smem:[#allocation2 + $0x4]]  ;;  %s542_s21 = sld [smem:[#allocation2 + $0x5]]  ;;  %v141_v22 = vshrl.u32 %v52_v0, 7 }
  0x34   :  { %s544_s22 = sld [smem:[#allocation2 + $0x6]]  ;;  %s546_s23 = sld [smem:[#allocation2 + $0x7]]  ;;  %v139_v54 = vunpack.c.0.s8 %v138_v18 }
  0x35   :  { %v54_v2 = vadd.s32 128, %v53_v1  ;;  %v55_v3 = vadd.s32 256, %v53_v1  ;;  %v56_v4 = vadd.s32 384, %v53_v1  ;;  %v57_v5 = vadd.s32 512, %v53_v1  ;;  %s485_s24 = smov [#allocation9]  }
  0x36   :  { %v58_v6 = vadd.s32 640, %v53_v1  ;;  %v59_v7 = vadd.s32 768, %v53_v1  ;;  %v60_v8 = vadd.s32 896, %v53_v1  ;;  %v61_v9 = vand.u32 1, %v53_v1  ;;  %s372_s25 = sshll.u32 %s485_s24, 4  ;;  %s373_s25 = int_to_ptr.vmem [resolvable:$true] %s372_s25 }
  0x37   :  { %v62_v10 = vand.u32 1, %v54_v2  ;;  %v63_v11 = vand.u32 1, %v55_v3  ;;  %v64_v12 = vand.u32 1, %v56_v4  ;;  %v65_v13 = vand.u32 1, %v57_v5  ;;  %s451_s26 = scalar_lea.vmem %s373_s25, 128  ;;  %p456_p6 = scmp.lt.s32.totalorder %s373_s25, %s373_s25 }
  0x38   :  { %v66_v14 = vand.u32 1, %v58_v6  ;;  %v67_v15 = vand.u32 1, %v59_v7  ;;  %v68_v16 = vand.u32 1, %v60_v8  ;;  %vm548_vm0 = vcmp.eq.s32.totalorder %v61_v9, 0  ;;  %p452_p5 = scmp.ne.s32.totalorder %s373_s25, %s451_s26  ;;  %p457_p7 = scmp.lt.s32.totalorder %s451_s26, %s451_s26 }
  0x39   :  { %v552_v20 = vstv %s77_s17  ;;  %v554_v21 = vstv %s383_s18  ;;  %vm556_vm1 = vcmp.eq.s32.totalorder %v62_v10, 0  ;;  %vm560_vm2 = vcmp.eq.s32.totalorder %v63_v11, 0 }
  0x3a   :  { %vm564_vm3 = vcmp.eq.s32.totalorder %v64_v12, 0  ;;  %vm568_vm4 = vcmp.eq.s32.totalorder %v65_v13, 0  ;;  %vm572_vm5 = vcmp.eq.s32.totalorder %v66_v14, 0  ;;  %vm576_vm6 = vcmp.eq.s32.totalorder %v67_v15, 0  ;;  %p458_p8 = por %p457_p7, %p456_p6 }
  0x3b   :  { %v91_v29 = vstv %s384_s19  ;;  %v92_v30 = vstv %s385_s20  ;;  %vm580_vm7 = vcmp.eq.s32.totalorder %v68_v16, 0  ;;  %v81_v32 = vsel %vm548_vm0, %v552_v20, %v554_v21 }
  0x3c   :  { %v82_v33 = vsel %vm556_vm1, %v552_v20, %v554_v21  ;;  %v592_v34 = vstv %s386_s2  ;;  %v83_v35 = vsel %vm560_vm2, %v552_v20, %v554_v21  ;;  %v84_v36 = vsel %vm564_vm3, %v552_v20, %v554_v21  ;;  %p459_p9 = pnand %p458_p8, %p452_p5 }
  0x3d   :  { %v85_v37 = vsel %vm568_vm4, %v552_v20, %v554_v21  ;;  %v86_v38 = vsel %vm572_vm5, %v552_v20, %v554_v21  ;;  %v87_v39 = vsel %vm576_vm6, %v552_v20, %v554_v21  ;;  %v88_v40 = vsel %vm580_vm7, %v552_v20, %v554_v21 }
  0x3e   :  { %v93_v41 = vsel %vm548_vm0, %v91_v29, %v92_v30  ;;  %v104_v42 = vstv %s542_s21  ;;  %v94_v43 = vsel %vm556_vm1, %v91_v29, %v92_v30  ;;  %v95_v44 = vsel %vm560_vm2, %v91_v29, %v92_v30 }
  0x3f   :  { %v115_v45 = vstv %s544_s22  ;;  %v116_v46 = vstv %s546_s23  ;;  %v96_v47 = vsel %vm564_vm3, %v91_v29, %v92_v30  ;;  %v97_v48 = vsel %vm568_vm4, %v91_v29, %v92_v30 }
  0x40   :  { %v98_v49 = vsel %vm572_vm5, %v91_v29, %v92_v30  ;;  %v99_v50 = vsel %vm576_vm6, %v91_v29, %v92_v30  ;;  %v100_v51 = vsel %vm580_vm7, %v91_v29, %v92_v30  ;;  %v105_v52 = vsel %vm548_vm0, %v592_v34, %v104_v42 }
  0x41   :  { %v133_v53 = vcombine.low %v81_v32, %v82_v33  ;;  %v106_v55 = vsel %vm556_vm1, %v592_v34, %v104_v42  ;;  %v117_v56 = vsel %vm548_vm0, %v115_v45, %v116_v46  ;;  %v118_v57 = vsel %vm556_vm1, %v115_v45, %v116_v46 }
  0x42   :  { %v119_v58 = vsel %vm560_vm2, %v115_v45, %v116_v46  ;;  %v120_v59 = vsel %vm564_vm3, %v115_v45, %v116_v46  ;;  %v651_v60 = vsub.s32 %v139_v54, %v141_v22  ;;  %v251_v61 = vcombine.low %v93_v41, %v94_v43 }
  0x43   :  { %v252_v62 = vcombine.low %v95_v44, %v96_v47  ;;  %v121_v63 = vsel %vm568_vm4, %v115_v45, %v116_v46  ;;  %v122_v0 = vsel %vm572_vm5, %v115_v45, %v116_v46  ;;  %v253_v1 = vcombine.low %v97_v48, %v98_v49 }
  0x44   :  { %v254_v2 = vcombine.low %v99_v50, %v100_v51  ;;  %v107_v3 = vsel %vm560_vm2, %v592_v34, %v104_v42  ;;  %v108_v4 = vsel %vm564_vm3, %v592_v34, %v104_v42  ;;  %v109_v5 = vsel %vm568_vm4, %v592_v34, %v104_v42 }
  0x45   :  { %v110_v6 = vsel %vm572_vm5, %v592_v34, %v104_v42  ;;  %v111_v7 = vsel %vm576_vm6, %v592_v34, %v104_v42  ;;  %v123_v8 = vsel %vm576_vm6, %v115_v45, %v116_v46  ;;  %v124_v9 = vsel %vm580_vm7, %v115_v45, %v116_v46 }
  0x46   :  { %v310_v10 = vcombine.low %v117_v56, %v118_v57  ;;  %v261_v11 = vrot.slane %v251_v61, %v651_v60  ;;  %v268_v12 = vrot.slane %v252_v62, %v651_v60  ;;  %v311_v13 = vcombine.low %v119_v58, %v120_v59 }
  0x47   :  { %v312_v14 = vcombine.low %v121_v63, %v122_v0  ;;  %v112_v15 = vsel %vm580_vm7, %v592_v34, %v104_v42  ;;  %v134_v16 = vcombine.low %v83_v35, %v84_v36  ;;  %v275_v17 = vrot.slane %v253_v1, %v651_v60  ;;  %v50_v35 = vld [vmem:[#allocation6] sm:$0xff]  ;;  %v51_v0 = vld [vmem:[#allocation7] sm:$0xff] }
  0x48   :  { %v282_v18 = vrot.slane %v254_v2, %v651_v60  ;;  %v135_v19 = vcombine.low %v85_v37, %v86_v38  ;;  %v136_v20 = vcombine.low %v87_v39, %v88_v40  ;;  %v283_v21 = vcombine.low %v261_v11, %v268_v12 }
  0x49   :  { %v313_v22 = vcombine.low %v123_v8, %v124_v9  ;;  %v192_v23 = vcombine.low %v105_v52, %v106_v55  ;;  %v193_v24 = vcombine.low %v107_v3, %v108_v4  ;;  %v320_v26 = vrot.slane %v310_v10, %v651_v60 }
  0x4a   :  { %v284_v25 = vcombine.low %v275_v17, %v282_v18  ;;  %v194_v27 = vcombine.low %v109_v5, %v110_v6  ;;  %v291_v28 = vrot.slane %v283_v21, %v651_v60  ;;  %v327_v29 = vrot.slane %v311_v13, %v651_v60 }
  0x4b   :  { %v334_v30 = vrot.slane %v312_v14, %v651_v60  ;;  %v143_v31 = vrot.slane %v133_v53, %v651_v60  ;;  %v195_v32 = vcombine.low %v111_v7, %v112_v15  ;;  %v341_v34 = vrot.slane %v313_v22, %v651_v60 }
  0x4c   :  { %v298_v33 = vrot.slane %v284_v25, %v651_v60  ;;  %v150_v36 = vrot.slane %v134_v16, %v651_v60  ;;  %v157_v37 = vrot.slane %v135_v19, %v651_v60  ;;  %v164_v38 = vrot.slane %v136_v20, %v651_v60 }
  0x4d   :  { %v342_v39 = vcombine.low %v320_v26, %v327_v29  ;;  %v343_v41 = vcombine.low %v334_v30, %v341_v34  ;;  %v202_v43 = vrot.slane %v192_v23, %v651_v60  ;;  %v209_v44 = vrot.slane %v193_v24, %v651_v60 }
  0x4e   :  { %v299_v40 = vcombine.low %v291_v28, %v298_v33  ;;  %v165_v47 = vcombine.low %v143_v31, %v150_v36  ;;  %v166_v48 = vcombine.low %v157_v37, %v164_v38  ;;  %v216_v49 = vrot.slane %v194_v27, %v651_v60 }
  0x4f   :  { %v350_v42 = vrot.slane %v342_v39, %v651_v60  ;;  %v357_v46 = vrot.slane %v343_v41, %v651_v60  ;;  %v223_v50 = vrot.slane %v195_v32, %v651_v60  ;;  %v224_v55 = vcombine.low %v202_v43, %v209_v44 }
  0x50   :  { %v301_v45 = vmul.f32 %v299_v40, %v50_v35  ;;  %v173_v53 = vrot.slane %v165_v47, %v651_v60  ;;  %v180_v54 = vrot.slane %v166_v48, %v651_v60 }
  0x51   :  { %v358_v51 = vcombine.low %v350_v42, %v357_v46  ;;  %v225_v56 = vcombine.low %v216_v49, %v223_v50  ;;  %v232_v59 = vrot.slane %v224_v55, %v651_v60 }
  0x52   :  { %v181_v58 = vcombine.low %v173_v53, %v180_v54 }
  0x53   :  { %v360_v52 = vadd.f32 %v358_v51, %v301_v45  ;;  %v239_v61 = vrot.slane %v225_v56, %v651_v60 }
  0x54   :  { %v183_v62 = vmul.f32 %v181_v58, %v50_v35 }
  0x55   :  { %v361_v57 = vmul.f32 1.442695, %v360_v52  ;;  %v240_v63 = vcombine.low %v232_v59, %v239_v61 }
  0x57   :  { %395 = vpow2.f32 %v361_v57  ;;  %v242_v1 = vadd.f32 %v240_v63, %v183_v62 }
  0x61   :  { %v396_v2 = vpop.eup %395 }
  0x62   :  { %v363_v3 = vmul.f32 %v396_v2, %v51_v0 }
  0x64   :  { %v364_v4 = vadd.f32 %v363_v3, %v242_v1 }
  0x66   :  { %365 = vst [vmem:[#allocation9] sm:$0xff] %v364_v4 }
  0x67   :  { %462 = shalt.err (!%p459_p9)
}
  0x68   :  { %s463_s29 = scalar_lea.hbm %s718_s3, 128 }
  0x69   :  { %p464_p10 = scmp.ne.s32.totalorder %s718_s3, %s463_s29  ;;  %p467_p11 = scmp.lt.u32.totalorder %s463_s29, %s718_s3 }
  0x6b   :  { %p469_p12 = pnand %p467_p11, %p464_p10 }
  0x6d   :  { %472 = shalt.err (!%p469_p12)
}
  0x6e   :  { %375 = dma.vmem_to_hbm [thread:$0]  %s373_s25, 128, %s718_s3, [#allocation4]  }
  0x6f   :  { %479 = dma.done.wait [#allocation4], 128  }
  0x70   :  { %480 = vsyncadd [#allocation4], 4294967168 }
  0x71   :  { %379 = vsyncpa [#allocation3], 1 }
  0x72   :  { %380 = vsyncpa [#allocation8], 1 }
  0x73   :  { %381 = vsyncpa [#allocation4], 1 }
  0x74   :  { %382 = vsyncpa [#allocation5], 1 }

</bundles_post_ra>
